<compile_context>
chip_gen: v7x
topology: tpu7x:2x2x1
jax: 0.10.0
libtpu: 0.0.40
codegen_flags: <defaults>
</compile_context>

<pallas_src>
import functools

import jax
import jax.numpy as jnp
from jax.experimental import pallas as pl
from jax.experimental.pallas import tpu as pltpu


def _num_tensorcores():
    """2 on dual-TensorCore parts (v4 / v5p megacore, v7x), else 1."""
    try:
        kind = jax.devices()[0].device_kind.lower()
    except Exception:
        return 1
    return 2 if any(t in kind for t in ("v7", "7x", "v5p", "v4")) else 1


def _symkl_kernel(x_ref, y_ref, o_ref, acc_ref, *, scale, n_rows, tile_n, steps):
    """One grid step handles a (tile_n, C) slab of both logit tensors.

    grid = (parallel_slices, reduction_steps).  The reduction axis (axis 1)
    folds the fused symmetric-KL integrand into an (8, C) f32 VMEM partial;
    only the last reduction step of each parallel slice collapses it to a
    scalar partial written to o_ref[slice].
    """
    i = pl.program_id(0)
    k = pl.program_id(1)

    @pl.when(k == 0)
    def _():
        acc_ref[...] = jnp.zeros_like(acc_ref)

    x = x_ref[...].astype(jnp.float32)
    y = y_ref[...].astype(jnp.float32)

    def stats(z):
        m = jnp.max(z, axis=-1, keepdims=True)
        s = z - m
        e = jnp.exp(s)
        se = jnp.sum(e, axis=-1, keepdims=True)
        return s, e, se

    s_x, e_x, se_x = stats(x)
    s_y, e_y, se_y = stats(y)

    # Exact per-row reciprocal (tiny (tile_n, 1) op) + broadcast multiply:
    # one exp per element per tensor, no per-element divides.
    inv_x = 1.0 / se_x
    inv_y = 1.0 / se_y
    dp = e_y * inv_y - e_x * inv_x                      # py - px

    # log_py - log_px without materializing either log-softmax:
    #   (s_y - s_x) - (log(sum_y) - log(sum_x))   (second term is (tile_n, 1))
    dlog = (s_y - s_x) - (jnp.log(se_y) - jnp.log(se_x))

    # Fused symmetric-KL integrand:
    #   sum(py*(log_py-log_px)) + sum(px*(log_px-log_py))
    #     == sum((py - px) * (log_py - log_px))
    # Row-validity mask zeroes the ragged boundary rows and any clamped
    # trailing grid slots; for full blocks it is all-true (one VPU select per
    # element -- free under the HBM roofline).
    row0 = (i * steps + k) * tile_n
    rows = jax.lax.broadcasted_iota(jnp.int32, (tile_n, 1), 0) + row0
    contrib = jnp.where(rows < n_rows, dp * dlog, 0.0)

    # Fold into the (8, C) partial: pure vreg adds, no full-tile RMW.
    acc_ref[...] += jnp.sum(contrib.reshape(tile_n // 8, 8, -1), axis=0)

    @pl.when(k == pl.num_programs(1) - 1)
    def _():
        o_ref[...] = (jnp.sum(acc_ref[...]) * scale).reshape(1, 1, 1)


def symmetric_kl(x, y, *, tile_n=None, num_parallel=None):
    """Pallas implementation of SymmetricKL.forward(x, y) -> scalar."""
    assert x.shape == y.shape and x.ndim == 2
    orig_n, c = x.shape
    n = orig_n
    itemsize = jnp.dtype(x.dtype).itemsize

    # Tiny batches: pad up to the 8-row sublane minimum.  Identical zero rows
    # in both tensors contribute exactly 0 (and are masked anyway).  Larger
    # ragged batches are handled purely in-kernel -- no HBM-copying jnp.pad.
    if n < 8:
        pad = ((0, 8 - n), (0, 0))
        x = jnp.pad(x, pad)
        y = jnp.pad(y, pad)
        n = 8

    # ---- VMEM-driven tile sizing -------------------------------------------
    try:
        vmem_cap = pltpu.get_tpu_info().vmem_capacity_bytes
    except Exception:
        vmem_cap = 64 << 20  # v7x-safe fallback
    vmem_limit = min(int(vmem_cap) * 3 // 4, 112 << 20)
    if tile_n is None:
        # Per tile row: 2 inputs x 2 pipeline buffers (input dtype) plus ~6
        # tile-sized f32 temporaries the compiler keeps live across the row
        # reductions (x, y casts / shifted / exp'ed / integrand).
        bytes_per_row = 4 * c * itemsize + 6 * 4 * c
        budget = (vmem_limit * 3) // 5          # ~60% of the scoped limit
        tile_n = budget // bytes_per_row
    tile_n = int(max(8, min(int(tile_n), 1024)))  # >1024 rows buys ~nothing
    tile_n = (tile_n // 8) * 8
    tile_n = min(tile_n, (n // 8) * 8)            # never exceed the batch

    num_blocks = pl.cdiv(n, tile_n)
    if num_parallel is None:
        num_parallel = _num_tensorcores()
    p = max(1, min(int(num_parallel), num_blocks))
    steps = pl.cdiv(num_blocks, p)

    scale = 0.5 / orig_n  # original batch size

    def idx(i, k):
        # Clamp so trailing (i, k) slots never point past the last real
        # block; their contribution is zeroed by the in-kernel row mask.
        return (jnp.minimum(i * steps + k, num_blocks - 1), 0)

    in_spec = pl.BlockSpec((tile_n, c), idx)

    partials = pl.pallas_call(
        functools.partial(_symkl_kernel, scale=scale, n_rows=orig_n,
                          tile_n=tile_n, steps=steps),
        out_shape=jax.ShapeDtypeStruct((p, 1, 1), jnp.float32),
        grid_spec=pltpu.PrefetchScalarGridSpec(
            num_scalar_prefetch=0,
            grid=(p, steps),
            in_specs=[in_spec, in_spec],
            out_specs=pl.BlockSpec((1, 1, 1), lambda i, k: (i, 0, 0)),
            scratch_shapes=[pltpu.VMEM((8, c), jnp.float32)],
        ),
        compiler_params=pltpu.CompilerParams(
            dimension_semantics=("parallel", "arbitrary"),
            vmem_limit_bytes=vmem_limit,
        ),
    )(x, y)
    return jnp.sum(partials)


def _reference_symmetric_kl(x, y):
    """Pure-JAX reference mirroring salad's KLDivWithLogits semantics."""
    n = x.shape[0]
    log_px = jax.nn.log_softmax(x.astype(jnp.float32), axis=1)
    log_py = jax.nn.log_softmax(y.astype(jnp.float32), axis=1)
    px = jnp.exp(log_px)
    py = jnp.exp(log_py)
    kl_xy = jnp.sum(py * (log_py - log_px)) / n
    kl_yx = jnp.sum(px * (log_px - log_py)) / n
    return 0.5 * (kl_xy + kl_yx)


if __name__ == "__main__":
    key = jax.random.PRNGKey(0)
    kx, ky, kx2, ky2, kx3, ky3 = jax.random.split(key, 6)

    # 1) Small class-logit shape consistent with the module (single block).
    N, C = 16, 32
    x = jax.random.normal(kx, (N, C), dtype=jnp.float32)
    y = jax.random.normal(ky, (N, C), dtype=jnp.float32)
    out = jax.block_until_ready(symmetric_kl(x, y))
    ref = _reference_symmetric_kl(x, y)
    assert jnp.allclose(out, ref, rtol=1e-5, atol=1e-5), (out, ref)

    # 2) Ragged batch + multi-step reduction + parallel partial-sum path
    #    (includes a clamped trailing grid slot and a masked boundary block).
    N2, C2 = 100, 32
    x2 = jax.random.normal(kx2, (N2, C2), dtype=jnp.float32)
    y2 = jax.random.normal(ky2, (N2, C2), dtype=jnp.float32)
    out2 = jax.block_until_ready(
        symmetric_kl(x2, y2, tile_n=24, num_parallel=2))
    ref2 = _reference_symmetric_kl(x2, y2)
    assert jnp.allclose(out2, ref2, rtol=1e-5, atol=1e-5), (out2, ref2)

    # 3) Tiny batch (< 8 rows) exercising the minimal sublane-padding path.
    N3, C3 = 6, 40
    x3 = jax.random.normal(kx3, (N3, C3), dtype=jnp.float32)
    y3 = jax.random.normal(ky3, (N3, C3), dtype=jnp.float32)
    out3 = jax.block_until_ready(symmetric_kl(x3, y3))
    ref3 = _reference_symmetric_kl(x3, y3)
    assert jnp.allclose(out3, ref3, rtol=1e-5, atol=1e-5), (out3, ref3)

    print("KERNEL_OK")
</pallas_src>

<mosaic_0001>
module attributes {stable_mosaic.version = 11 : i64} {
  func.func @_symkl_kernel(%arg0: i32, %arg1: i32, %arg2: memref<16x32xf32, #tpu.memory_space<vmem>>, %arg3: memref<16x32xf32, #tpu.memory_space<vmem>>, %arg4: memref<1x1x1xf32, #tpu.memory_space<vmem>>, %arg5: memref<8x32xf32, #tpu.memory_space<vmem>>) attributes {dimension_semantics = [#tpu.dimension_semantics<parallel>, #tpu.dimension_semantics<arbitrary>], iteration_bounds = array<i64: 1, 1>, scalar_prefetch = 0 : i64, scratch_operands = 1 : i64, tpu.core_type = #tpu.core_type<tc>, window_params = [{transform_indices = @transform_0, window_bounds = array<i64: 16, 32>}, {transform_indices = @transform_1, window_bounds = array<i64: 16, 32>}, {transform_indices = @transform_2, window_bounds = array<i64: 1, 1, 1>}]} {
    %c0_i32 = arith.constant 0 : i32
    %0 = arith.cmpi eq, %arg1, %c0_i32 : i32
    %1 = arith.extui %0 : i1 to i32
    %c0_i32_0 = arith.constant 0 : i32
    %2 = arith.cmpi ne, %1, %c0_i32_0 : i32
    scf.if %2 {
      %cst_18 = arith.constant 0.000000e+00 : f32
      %55 = vector.broadcast %cst_18 : f32 to vector<8x32xf32>
      %c0_19 = arith.constant 0 : index
      %c0_20 = arith.constant 0 : index
      %56 = vector.load %arg5[%c0_19, %c0_20] : memref<8x32xf32, #tpu.memory_space<vmem>>, vector<8x32xf32>
      tpu.vector_store %arg5[%c0_19, %c0_20], %55 {strides = array<i32>} : memref<8x32xf32, #tpu.memory_space<vmem>>, vector<8x32xf32>,
    } else {
    }
    %c0 = arith.constant 0 : index
    %c0_1 = arith.constant 0 : index
    %3 = vector.load %arg2[%c0, %c0_1] : memref<16x32xf32, #tpu.memory_space<vmem>>, vector<16x32xf32>
    %c0_2 = arith.constant 0 : index
    %c0_3 = arith.constant 0 : index
    %4 = vector.load %arg3[%c0_2, %c0_3] : memref<16x32xf32, #tpu.memory_space<vmem>>, vector<16x32xf32>
    %cst = arith.constant dense<0xFF800000> : vector<16xf32>
    %5 = vector.multi_reduction <maximumf>, %3, %cst [1] : vector<16x32xf32> to vector<16xf32>
    %6 = vector.shape_cast %5 : vector<16xf32> to vector<16x1xf32>
    %7 = vector.broadcast %6 : vector<16x1xf32> to vector<16x32xf32>
    %8 = arith.subf %3, %7 : vector<16x32xf32>
    %9 = math.exp %8 : vector<16x32xf32>
    %cst_4 = arith.constant dense<0.000000e+00> : vector<16xf32>
    %10 = vector.multi_reduction <add>, %9, %cst_4 [1] : vector<16x32xf32> to vector<16xf32>
    %11 = vector.shape_cast %10 : vector<16xf32> to vector<16x1xf32>
    %cst_5 = arith.constant dense<0xFF800000> : vector<16xf32>
    %12 = vector.multi_reduction <maximumf>, %4, %cst_5 [1] : vector<16x32xf32> to vector<16xf32>
    %13 = vector.shape_cast %12 : vector<16xf32> to vector<16x1xf32>
    %14 = vector.broadcast %13 : vector<16x1xf32> to vector<16x32xf32>
    %15 = arith.subf %4, %14 : vector<16x32xf32>
    %16 = math.exp %15 : vector<16x32xf32>
    %cst_6 = arith.constant dense<0.000000e+00> : vector<16xf32>
    %17 = vector.multi_reduction <add>, %16, %cst_6 [1] : vector<16x32xf32> to vector<16xf32>
    %18 = vector.shape_cast %17 : vector<16xf32> to vector<16x1xf32>
    %cst_7 = arith.constant 1.000000e+00 : f32
    %19 = vector.broadcast %cst_7 : f32 to vector<16x1xf32>
    %20 = arith.divf %19, %11 : vector<16x1xf32>
    %cst_8 = arith.constant 1.000000e+00 : f32
    %21 = vector.broadcast %cst_8 : f32 to vector<16x1xf32>
    %22 = arith.divf %21, %18 : vector<16x1xf32>
    %23 = vector.broadcast %22 : vector<16x1xf32> to vector<16x32xf32>
    %24 = arith.mulf %16, %23 : vector<16x32xf32>
    %25 = vector.broadcast %20 : vector<16x1xf32> to vector<16x32xf32>
    %26 = arith.mulf %9, %25 : vector<16x32xf32>
    %27 = arith.subf %24, %26 : vector<16x32xf32>
    %28 = arith.subf %15, %8 : vector<16x32xf32>
    %29 = math.log %18 : vector<16x1xf32>
    %30 = math.log %11 : vector<16x1xf32>
    %31 = arith.subf %29, %30 : vector<16x1xf32>
    %32 = vector.broadcast %31 : vector<16x1xf32> to vector<16x32xf32>
    %33 = arith.subf %28, %32 : vector<16x32xf32>
    %c1_i32 = arith.constant 1 : i32
    %34 = arith.muli %arg0, %c1_i32 : i32
    %35 = arith.addi %34, %arg1 : i32
    %c16_i32 = arith.constant 16 : i32
    %36 = arith.muli %35, %c16_i32 : i32
    %37 = tpu.iota {dimensions = array<i32: 0>} : vector<16x1xi32>
    %38 = vector.broadcast %36 : i32 to vector<16x1xi32>
    %39 = arith.addi %37, %38 : vector<16x1xi32>
    %c16_i32_9 = arith.constant 16 : i32
    %40 = vector.broadcast %c16_i32_9 : i32 to vector<16x1xi32>
    %41 = arith.cmpi slt, %39, %40 : vector<16x1xi32>
    %42 = arith.mulf %27, %33 : vector<16x32xf32>
    %cst_10 = arith.constant 0.000000e+00 : f32
    %43 = vector.shape_cast %41 : vector<16x1xi1> to vector<16x1xi1>
    %44 = vector.broadcast %43 : vector<16x1xi1> to vector<16x32xi1>
    %45 = vector.broadcast %cst_10 : f32 to vector<16x32xf32>
    %46 = arith.select %44, %42, %45 : vector<16x32xi1>, vector<16x32xf32>
    %c0_11 = arith.constant 0 : index
    %c0_12 = arith.constant 0 : index
    %47 = vector.load %arg5[%c0_11, %c0_12] : memref<8x32xf32, #tpu.memory_space<vmem>>, vector<8x32xf32>
    %48 = vector.shape_cast %46 : vector<16x32xf32> to vector<2x8x32xf32>
    %cst_13 = arith.constant dense<0.000000e+00> : vector<8x32xf32>
    %49 = vector.multi_reduction <add>, %48, %cst_13 [0] : vector<2x8x32xf32> to vector<8x32xf32>
    %50 = arith.addf %47, %49 : vector<8x32xf32>
    %c0_14 = arith.constant 0 : index
    %c0_15 = arith.constant 0 : index
    %51 = vector.load %arg5[%c0_14, %c0_15] : memref<8x32xf32, #tpu.memory_space<vmem>>, vector<8x32xf32>
    tpu.vector_store %arg5[%c0_14, %c0_15], %50 {strides = array<i32>} : memref<8x32xf32, #tpu.memory_space<vmem>>, vector<8x32xf32>,
    %c0_i32_16 = arith.constant 0 : i32
    %52 = arith.cmpi eq, %arg1, %c0_i32_16 : i32
    %53 = arith.extui %52 : i1 to i32
    %c0_i32_17 = arith.constant 0 : i32
    %54 = arith.cmpi ne, %53, %c0_i32_17 : i32
    scf.if %54 {
      %c0_18 = arith.constant 0 : index
      %c0_19 = arith.constant 0 : index
      %55 = vector.load %arg5[%c0_18, %c0_19] : memref<8x32xf32, #tpu.memory_space<vmem>>, vector<8x32xf32>
      %56 = vector.shape_cast %55 : vector<8x32xf32> to vector<1x8x32xf32>
      %cst_20 = arith.constant dense<0.000000e+00> : vector<1xf32>
      %57 = vector.multi_reduction <add>, %56, %cst_20 [1, 2] : vector<1x8x32xf32> to vector<1xf32>
      %58 = vector.shape_cast %57 : vector<1xf32> to vector<1x1x1xf32>
      %59 = vector.extract %58[0, 0, 0] : f32 from vector<1x1x1xf32>
      %cst_21 = arith.constant 3.125000e-02 : f32
      %60 = arith.mulf %59, %cst_21 : f32
      %61 = vector.broadcast %60 : f32 to vector<1x1x1xf32>
      %c0_22 = arith.constant 0 : index
      %c0_23 = arith.constant 0 : index
      %c0_24 = arith.constant 0 : index
      %62 = vector.load %arg4[%c0_22, %c0_23, %c0_24] : memref<1x1x1xf32, #tpu.memory_space<vmem>>, vector<1x1x1xf32>
      tpu.vector_store %arg4[%c0_22, %c0_23, %c0_24], %61 {strides = array<i32>} : memref<1x1x1xf32, #tpu.memory_space<vmem>>, vector<1x1x1xf32>,
    } else {
    }
    return
  }
  func.func @transform_0(%arg0: i32, %arg1: i32) -> (i32, i32) {
    %c1_i32 = arith.constant 1 : i32
    %0 = arith.muli %arg0, %c1_i32 : i32
    %1 = arith.addi %0, %arg1 : i32
    %c0_i32 = arith.constant 0 : i32
    %2 = arith.minsi %1, %c0_i32 : i32
    %c0_i32_0 = arith.constant 0 : i32
    %c0_i32_1 = arith.constant 0 : i32
    return %2, %c0_i32_0 : i32, i32
  }
  func.func @transform_1(%arg0: i32, %arg1: i32) -> (i32, i32) {
    %c1_i32 = arith.constant 1 : i32
    %0 = arith.muli %arg0, %c1_i32 : i32
    %1 = arith.addi %0, %arg1 : i32
    %c0_i32 = arith.constant 0 : i32
    %2 = arith.minsi %1, %c0_i32 : i32
    %c0_i32_0 = arith.constant 0 : i32
    %c0_i32_1 = arith.constant 0 : i32
    return %2, %c0_i32_0 : i32, i32
  }
  func.func @transform_2(%arg0: i32, %arg1: i32) -> (i32, i32, i32) {
    %c0_i32 = arith.constant 0 : i32
    %c0_i32_0 = arith.constant 0 : i32
    %c0_i32_1 = arith.constant 0 : i32
    return %arg0, %c0_i32, %c0_i32_0 : i32, i32, i32
  }
}

</mosaic_0001>

<bundles_post_ra>
// kernel: tpu_custom_call.1
= control target key start
LH: loop header
LB: loop body
LE: loop exit
PB: predicated region body
PF: predicated region fallthrough
CT: control target
= control target key end

     0   :  { %7 = vsyncpa [#allocation4], 0  ;;  %s371_s0 = inlined_call_operand.hbm [shape: f32[16,32], index: 0, kind: input, shape index: {}]   ;;  %s372_s1 = inlined_call_operand.hbm [shape: f32[16,32], index: 1, kind: input, shape index: {}]   ;;  %s373_s2 = inlined_call_operand.hbm [shape: f32[1,1,1], index: 2, kind: output, shape index: {}]  }
   0x1   :  { %8 = vsyncpa [#allocation7], 0 }
   0x2   :  { %9 = vsyncpa [#allocation5], 0  ;;  %s301_s9 = smov [#allocation3]   ;;  %s229_s13 = scalar_lea.hbm %s371_s0, 256 }
   0x3   :  { %s21_s10 = sshll.u32 %s301_s9, 4  ;;  %p230_p0 = scmp.ne.s32.totalorder %s371_s0, %s229_s13  ;;  %s22_s10 = int_to_ptr.vmem [resolvable:$true] %s21_s10 }
   0x4   :  { %p233_p1 = scmp.lt.u32.totalorder %s229_s13, %s371_s0 }
   0x6   :  { %p235_p2 = pnand %p233_p1, %p230_p0 }
   0x8   :  { %238 = shalt.err (!%p235_p2)
}
   0x9   :  { %s239_s18 = scalar_lea.vmem %s22_s10, 256  ;;  %p244_p4 = scmp.lt.s32.totalorder %s22_s10, %s22_s10 }
   0xa   :  { %p240_p3 = scmp.ne.s32.totalorder %s22_s10, %s239_s18  ;;  %p245_p5 = scmp.lt.s32.totalorder %s239_s18, %s239_s18 }
   0xc   :  { %p246_p6 = por %p245_p5, %p244_p4 }
   0xe   :  { %p247_p7 = pnand %p246_p6, %p240_p3 }
  0x10   :  { %250 = shalt.err (!%p247_p7)
}
  0x11   :  { %s302_s19 = smov 128   ;;  %s303_s20 = smov 8  }
  0x12   :  { %27 = dma.hbm_to_vmem [thread:$0]  %s371_s0, 256, %s22_s10, [#allocation4], %s302_s19, %s302_s19, %s303_s20  }
  0x13   :  { %s304_s23 = smov [#allocation6]   ;;  %s251_s27 = scalar_lea.hbm %s372_s1, 256 }
  0x14   :  { %s39_s24 = sshll.u32 %s304_s23, 4  ;;  %p252_p8 = scmp.ne.s32.totalorder %s372_s1, %s251_s27  ;;  %s40_s24 = int_to_ptr.vmem [resolvable:$true] %s39_s24 }
  0x15   :  { %p255_p9 = scmp.lt.u32.totalorder %s251_s27, %s372_s1 }
  0x17   :  { %p257_p10 = pnand %p255_p9, %p252_p8 }
  0x19   :  { %260 = shalt.err (!%p257_p10)
}
  0x1a   :  { %s261_s4 = scalar_lea.vmem %s40_s24, 256  ;;  %p266_p12 = scmp.lt.s32.totalorder %s40_s24, %s40_s24 }
  0x1b   :  { %p262_p11 = scmp.ne.s32.totalorder %s40_s24, %s261_s4  ;;  %p267_p13 = scmp.lt.s32.totalorder %s261_s4, %s261_s4 }
  0x1d   :  { %p268_p0 = por %p267_p13, %p266_p12 }
  0x1f   :  { %p269_p1 = pnand %p268_p0, %p262_p11 }
  0x21   :  { %272 = shalt.err (!%p269_p1)
}
  0x22   :  { %45 = dma.hbm_to_vmem [thread:$0]  %s372_s1, 256, %s40_s24, [#allocation7], %s302_s19, %s302_s19, %s303_s20  }
  0x23   :  { %295 = dma.done.wait [#allocation4], 256  }
  0x24   :  { %296 = vsyncadd [#allocation4], 4294967040 }
  0x25   :  { %297 = dma.done.wait [#allocation7], 256  }
  0x26   :  { %298 = vsyncadd [#allocation7], 4294967040  ;;  %vm64_vm0 = vcmask 261120   ;;  %v305_v0 = vmov 0.0   ;;  %v68_v1 = vld [vmem:[#allocation6] sm:$0xff]  ;;  %v66_v2 = vld [vmem:[#allocation3] sm:$0xff] }
  0x27   :  { %65 = vst.msk [vmem:[#allocation2] sm:$0xff] %vm64_vm0, %v305_v0  ;;  %v69_v3 = vld [vmem:[#allocation6 + $0x8] sm:$0xff]  ;;  %v89_v4 = vsel %vm64_vm0, %v68_v1, -inf  ;;  %v71_v5 = vsel %vm64_vm0, %v66_v2, -inf  ;;  %v67_v6 = vld [vmem:[#allocation3 + $0x8] sm:$0xff]  ;;  %s306_s1 = smov [#allocation8]  }
  0x28   :  { %90 = vmax.xlane.f32.xlu1 %v89_v4  ;;  %72 = vmax.xlane.f32.xlu0 %v71_v5  ;;  %v92_v7 = vsel %vm64_vm0, %v69_v3, -inf  ;;  %v74_v8 = vsel %vm64_vm0, %v67_v6, -inf  ;;  %s183_s6 = sshll.u32 %s306_s1, 4  ;;  %vm175_vm1 = vcmask 0   ;;  %s184_s6 = int_to_ptr.vmem [resolvable:$true] %s183_s6 }
  0x29   :  { %s273_s9 = scalar_lea.vmem %s184_s6, 16  ;;  %s277_s10 = scalar_lea.vmem %s184_s6, 32 }
  0x2a   :  { %p274_p2 = scmp.ne.s32.totalorder %s184_s6, %s273_s9  ;;  %p278_p3 = scmp.lt.s32.totalorder %s184_s6, %s184_s6 }
  0x2b   :  { %p279_p4 = scmp.lt.s32.totalorder %s277_s10, %s273_s9 }
  0x2c   :  { %93 = vmax.xlane.f32.xlu1 %v92_v7  ;;  %75 = vmax.xlane.f32.xlu0 %v74_v8 }
  0x2d   :  { %p280_p5 = por %p279_p4, %p278_p3 }
  0x2e   :  { %v153_v60 = vld [vmem:[#allocation2] sm:$0xff] }
  0x2f   :  { %p281_p6 = pnand %p280_p5, %p274_p2 }
  0xb5   :  { %v91_v9 = vpop.xlane.xlu1 %90  ;;  %v73_v10 = vpop.xlane.xlu0 %72 }
  0xb6   :  { %v95_v11 = vsub.f32 %v68_v1, %v91_v9  ;;  %v77_v12 = vsub.f32 %v66_v2, %v73_v10 }
  0xb8   :  { %v97_v13 = vmul.f32 1.442695, %v95_v11  ;;  %v79_v14 = vmul.f32 1.442695, %v77_v12  ;;  %v121_v15 = vsub.f32 %v95_v11, %v77_v12 }
  0xb9   :  { %v94_v16 = vpop.xlane.xlu1 %93  ;;  %v76_v17 = vpop.xlane.xlu0 %75 }
  0xba   :  { %205 = vpow2.f32 %v97_v13  ;;  %v96_v18 = vsub.f32 %v69_v3, %v94_v16  ;;  %v78_v19 = vsub.f32 %v67_v6, %v76_v17 }
  0xbb   :  { %207 = vpow2.f32 %v79_v14 }
  0xbc   :  { %v99_v20 = vmul.f32 1.442695, %v96_v18  ;;  %v81_v21 = vmul.f32 1.442695, %v78_v19  ;;  %v122_v22 = vsub.f32 %v96_v18, %v78_v19 }
  0xbe   :  { %209 = vpow2.f32 %v99_v20 }
  0xbf   :  { %211 = vpow2.f32 %v81_v21 }
  0xc4   :  { %v206_v23 = vpop.eup %205 }
  0xc5   :  { %v208_v24 = vpop.eup %207  ;;  %v101_v27 = vsel %vm64_vm0, %v206_v23, 0.0 }
  0xc6   :  { %v83_v25 = vsel %vm64_vm0, %v208_v24, 0.0 }
  0xc7   :  { %84 = vadd.xlane.f32.xlu0 %v83_v25 }
  0xc8   :  { %v210_v26 = vpop.eup %209 }
  0xc9   :  { %v212_v28 = vpop.eup %211  ;;  %v104_v30 = vsel %vm64_vm0, %v210_v26, 0.0 }
  0xca   :  { %v86_v29 = vsel %vm64_vm0, %v212_v28, 0.0 }
  0xcb   :  { %102 = vadd.xlane.f32.xlu0 %v101_v27  ;;  %87 = vadd.xlane.f32.xlu1 %v86_v29 }
  0xcf   :  { %105 = vadd.xlane.f32.xlu1 %v104_v30 }
 0x154   :  { %v85_v31 = vpop.xlane.xlu0 %84 }
 0x155   :  { %213 = vrcp.f32 %v85_v31 }
 0x156   :  { %215 = vlog2.f32 %v85_v31 }
 0x158   :  { %v88_v32 = vpop.xlane.xlu1 %87  ;;  %v103_v33 = vpop.xlane.xlu0 %102 }
 0x159   :  { %217 = vrcp.f32 %v88_v32 }
 0x15a   :  { %219 = vlog2.f32 %v88_v32 }
 0x15b   :  { %221 = vrcp.f32 %v103_v33 }
 0x15c   :  { %223 = vlog2.f32 %v103_v33  ;;  %v106_v34 = vpop.xlane.xlu1 %105 }
 0x15d   :  { %225 = vrcp.f32 %v106_v34 }
 0x15e   :  { %227 = vlog2.f32 %v106_v34 }
 0x15f   :  { %v214_v35 = vpop.eup %213 }
 0x160   :  { %v216_v36 = vpop.eup %215  ;;  %v117_v46 = vmul.f32 %v214_v35, %v208_v24 }
 0x161   :  { %v128_v42 = vmul.f32 0.6931472, %v216_v36 }
 0x163   :  { %v218_v37 = vpop.eup %217 }
 0x164   :  { %v220_v38 = vpop.eup %219  ;;  %v118_v51 = vmul.f32 %v218_v37, %v212_v28 }
 0x165   :  { %v222_v39 = vpop.eup %221  ;;  %v130_v47 = vmul.f32 0.6931472, %v220_v38 }
 0x166   :  { %v224_v40 = vpop.eup %223  ;;  %v115_v43 = vmul.f32 %v222_v39, %v206_v23 }
 0x167   :  { %v226_v41 = vpop.eup %225  ;;  %v124_v44 = vmul.f32 0.6931472, %v224_v40 }
 0x168   :  { %v228_v45 = vpop.eup %227  ;;  %v116_v49 = vmul.f32 %v226_v41, %v210_v26  ;;  %v119_v52 = vsub.f32 %v115_v43, %v117_v46 }
 0x169   :  { %v131_v48 = vsub.f32 %v124_v44, %v128_v42  ;;  %v126_v50 = vmul.f32 0.6931472, %v228_v45 }
 0x16a   :  { %v120_v56 = vsub.f32 %v116_v49, %v118_v51 }
 0x16b   :  { %v133_v53 = vsub.f32 %v121_v15, %v131_v48  ;;  %v132_v54 = vsub.f32 %v126_v50, %v130_v47 }
 0x16d   :  { %v145_v55 = vmul.f32 %v133_v53, %v119_v52  ;;  %v134_v57 = vsub.f32 %v122_v22, %v132_v54 }
 0x16f   :  { %v146_v58 = vmul.f32 %v134_v57, %v120_v56  ;;  %v154_v59 = vsel %vm64_vm0, %v145_v55, 0.0 }
 0x171   :  { %v155_v61 = vsel %vm64_vm0, %v146_v58, 0.0 }
 0x172   :  { %v156_v62 = vadd.f32 %v155_v61, %v154_v59 }
 0x174   :  { %v157_v63 = vadd.f32 %v156_v62, %v153_v60 }
 0x176   :  { %158 = vst.msk [vmem:[#allocation2] sm:$0xff] %vm64_vm0, %v157_v63 }
 0x17d   :  { %v162_v0 = vld [vmem:[#allocation2] sm:$0xff] }
 0x17e   :  { %v163_v1 = vsel %vm64_vm0, %v162_v0, 0.0 }
 0x17f   :  { %164 = vadd.xlane.f32.xlu0 %v163_v1 }
 0x20c   :  { %v165_v2 = vpop.xlane.xlu0 %164 }
 0x20d   :  { %v166_v3 = vrot.slane %v165_v2, 4 }
 0x20f   :  { %v167_v4 = vadd.f32 %v166_v3, %v165_v2 }
 0x211   :  { %v168_v5 = vrot.slane %v167_v4, 2 }
 0x213   :  { %v169_v6 = vadd.f32 %v168_v5, %v167_v4 }
 0x215   :  { %v170_v7 = vrot.slane %v169_v6, 1 }
 0x217   :  { %v171_v8 = vadd.f32 %v170_v7, %v169_v6 }
 0x219   :  { %197 = vpush %v171_v8 }
 0x24a   :  { %s198_s7 = spop %197 }
 0x24b   :  { %s173_s8 = smul.f32 0.03125, %s198_s7 }
 0x24d   :  { %v174_v9 = vstv %s173_s8 }
 0x24e   :  { %176 = vst.msk [vmem:[#allocation8] sm:$0x1] %vm175_vm1, %v174_v9 }
 0x24f   :  { %284 = shalt.err (!%p281_p6)
}
 0x250   :  { %s285_s13 = scalar_lea.hbm %s373_s2, 16 }
 0x251   :  { %p286_p7 = scmp.ne.s32.totalorder %s373_s2, %s285_s13  ;;  %p289_p8 = scmp.lt.u32.totalorder %s285_s13, %s373_s2 }
 0x253   :  { %p291_p9 = pnand %p289_p8, %p286_p7 }
 0x255   :  { %294 = shalt.err (!%p291_p9)
}
 0x256   :  { %186 = dma.vmem_to_hbm [thread:$0]  %s184_s6, 16, %s373_s2, [#allocation5]  }
 0x257   :  { %299 = dma.done.wait [#allocation5], 16  }
 0x258   :  { %300 = vsyncadd [#allocation5], 4294967280 }
 0x259   :  { %190 = vsyncpa [#allocation4], 1 }
 0x25a   :  { %191 = vsyncpa [#allocation7], 1 }
 0x25b   :  { %192 = vsyncpa [#allocation5], 1 }

</bundles_post_ra>
